<compile_context>
chip_gen: v6e
topology: v6e:2x2x1
jax: 0.10.0
libtpu: 0.0.40
codegen_flags: <defaults>
</compile_context>

<pallas_src>
import functools

import jax
import jax.numpy as jnp
from jax.experimental import pallas as pl
from jax.experimental.pallas import tpu as pltpu


def _lifted_structure_loss_kernel(emb_ref, lab_col_ref, lab_row_ref, loss_ref,
                                  *, margin, eps):
    e = emb_ref[...].astype(jnp.float32)                      # (B, Dp)
    b = e.shape[0]

    # Gram matrix on the MXU: prod[i, j] = <e_i, e_j>. Contract the last dims
    # of e with itself -> no explicit transpose needed.
    prod = jax.lax.dot_general(
        e, e, (((1,), (1,)), ((), ())),
        preferred_element_type=jnp.float32)                   # (B, B)

    row = jax.lax.broadcasted_iota(jnp.int32, (b, b), 0)
    col = jax.lax.broadcasted_iota(jnp.int32, (b, b), 1)
    eye = (row == col).astype(jnp.float32)

    # diag(prod) as a column / row vector (XLU reductions, no transpose).
    diag_col = jnp.sum(prod * eye, axis=1, keepdims=True)     # (B, 1): prod[i, i]
    diag_row = jnp.sum(prod * eye, axis=0, keepdims=True)     # (1, B): prod[j, j]

    # pdist: clamp(min=0) then clamp(min=eps).sqrt()
    dist2 = jnp.maximum(diag_col + diag_row - 2.0 * prod, 0.0)
    d = jnp.sqrt(jnp.maximum(dist2, eps))                     # (B, B)

    # Same-label indicator.
    pos = (lab_col_ref[...] == lab_row_ref[...]).astype(jnp.float32)  # (B, B)

    # Negative component. expd is symmetric (d and pos are), so its row sum
    # and column sum both equal neg_i, laid out along sublanes / lanes.
    expd = jnp.exp(margin - d) * (1.0 - pos)
    s_col = jnp.sum(expd, axis=1, keepdims=True)              # (B, 1): neg_i
    s_row = jnp.sum(expd, axis=0, keepdims=True)              # (1, B): neg_j
    neg = s_col + s_row                                       # (B, B): neg_i + neg_j

    triu = (col > row).astype(jnp.float32)                    # strict upper triangle
    term = jnp.maximum(pos * triu * (jnp.log(neg) + d), 0.0)  # F.relu(...)
    num = jnp.sum(term * term)
    den = jnp.sum(pos) - jnp.float32(b)

    loss_ref[0, 0] = num / den


def lifted_structure_loss(embeddings, labels, *, margin=1.0, eps=1e-4):
    """embeddings: (B, D) float, labels: (B,) int. Returns (loss, 0) like the module."""
    b, d = embeddings.shape

    # Lane-dense feature dim: zero-pad D to a multiple of 128 (Gram matrix is
    # unchanged by zero columns).
    dp = max(128, ((d + 127) // 128) * 128)
    if dp != d:
        embeddings = jnp.pad(embeddings, ((0, 0), (0, dp - d)))

    labels = labels.astype(jnp.int32)
    lab_col = labels.reshape(b, 1)
    lab_row = labels.reshape(1, b)

    itemsize = jnp.dtype(embeddings.dtype).itemsize
    cost = pl.CostEstimate(
        flops=2 * b * b * dp + 16 * b * b,
        transcendentals=3 * b * b,                    # exp, log, sqrt over (B, B)
        bytes_accessed=b * dp * itemsize + 2 * b * 4 + 4,
    )

    kernel = functools.partial(
        _lifted_structure_loss_kernel, margin=float(margin), eps=float(eps))

    loss = pl.pallas_call(
        kernel,
        out_shape=jax.ShapeDtypeStruct((1, 1), jnp.float32),
        in_specs=[
            pl.BlockSpec(memory_space=pltpu.MemorySpace.VMEM),   # embeddings (B, Dp)
            pl.BlockSpec(memory_space=pltpu.MemorySpace.VMEM),   # labels (B, 1)
            pl.BlockSpec(memory_space=pltpu.MemorySpace.VMEM),   # labels (1, B)
        ],
        out_specs=pl.BlockSpec(memory_space=pltpu.MemorySpace.SMEM),
        cost_estimate=cost,
    )(embeddings, lab_col, lab_row)

    return loss[0, 0], 0


def _reference(embeddings, labels, *, margin=1.0, eps=1e-4):
    """Pure-JAX transcription of the PyTorch forward."""
    e = embeddings.astype(jnp.float32)
    prod = e @ e.T
    norm = jnp.diag(prod)[:, None]
    res = jnp.maximum(norm + norm.T - 2.0 * prod, 0.0)
    dmat = jnp.sqrt(jnp.maximum(res, eps))
    pos = (labels[:, None] == labels[None, :]).astype(dmat.dtype)
    neg_i = jnp.sum(jnp.exp(margin - dmat) * (1.0 - pos), axis=1)
    neg = neg_i[None, :] + neg_i[:, None]
    triu = jnp.triu(pos, k=1)
    term = jax.nn.relu(triu * (jnp.log(neg) + dmat))
    return jnp.sum(term ** 2) / (jnp.sum(pos) - dmat.shape[0])


if __name__ == "__main__":
    key = jax.random.PRNGKey(0)
    B, D = 8, 32

    embeddings = jax.random.normal(key, (B, D), dtype=jnp.float32)
    labels = jnp.array([0, 0, 1, 1, 2, 2, 3, 3], dtype=jnp.int32)

    loss, zero = lifted_structure_loss(embeddings, labels)
    loss = jax.block_until_ready(loss)

    ref = _reference(embeddings, labels)
    assert zero == 0
    assert jnp.isfinite(loss)
    assert jnp.allclose(loss, ref, rtol=1e-4, atol=1e-5), (loss, ref)

    print("KERNEL_OK")
</pallas_src>

<mosaic_0001>
module attributes {stable_mosaic.version = 11 : i64} {
  func.func @_lifted_structure_loss_kernel(%arg0: memref<8x128xf32, #tpu.memory_space<vmem>>, %arg1: memref<8x1xi32, #tpu.memory_space<vmem>>, %arg2: memref<1x8xi32, #tpu.memory_space<vmem>>, %arg3: memref<1x1xf32, #tpu.memory_space<smem>>) attributes {dimension_semantics = [], scalar_prefetch = 0 : i64, scratch_operands = 0 : i64, tpu.core_type = #tpu.core_type<tc>} {
    %c0 = arith.constant 0 : index
    %c0_0 = arith.constant 0 : index
    %0 = vector.load %arg0[%c0, %c0_0] : memref<8x128xf32, #tpu.memory_space<vmem>>, vector<8x128xf32>
    %cst = arith.constant dense<0.000000e+00> : vector<8x8xf32>
    %1 = tpu.matmul %0, %0, %cst {dimension_numbers = #tpu.dot_dimension_numbers<[1], [1], [0], [0], [0, 0, 1, 0], [], []>} : vector<8x128xf32>, vector<8x128xf32>, vector<8x8xf32> -> vector<8x8xf32>
    %2 = tpu.iota {dimensions = array<i32: 0>} : vector<8x8xi32>
    %3 = tpu.iota {dimensions = array<i32: 1>} : vector<8x8xi32>
    %4 = arith.cmpi eq, %2, %3 : vector<8x8xi32>
    %5 = arith.extui %4 : vector<8x8xi1> to vector<8x8xi32>
    %6 = arith.sitofp %5 : vector<8x8xi32> to vector<8x8xf32>
    %7 = arith.mulf %1, %6 : vector<8x8xf32>
    %cst_1 = arith.constant dense<0.000000e+00> : vector<8xf32>
    %8 = vector.multi_reduction <add>, %7, %cst_1 [1] : vector<8x8xf32> to vector<8xf32>
    %9 = vector.shape_cast %8 : vector<8xf32> to vector<8x1xf32>
    %10 = arith.mulf %1, %6 : vector<8x8xf32>
    %cst_2 = arith.constant dense<0.000000e+00> : vector<8xf32>
    %11 = vector.multi_reduction <add>, %10, %cst_2 [0] : vector<8x8xf32> to vector<8xf32>
    %12 = vector.shape_cast %11 : vector<8xf32> to vector<1x8xf32>
    %13 = vector.broadcast %9 : vector<8x1xf32> to vector<8x8xf32>
    %14 = vector.broadcast %12 : vector<1x8xf32> to vector<8x8xf32>
    %15 = arith.addf %13, %14 : vector<8x8xf32>
    %cst_3 = arith.constant 2.000000e+00 : f32
    %16 = vector.broadcast %cst_3 : f32 to vector<8x8xf32>
    %17 = arith.mulf %16, %1 : vector<8x8xf32>
    %18 = arith.subf %15, %17 : vector<8x8xf32>
    %cst_4 = arith.constant 0.000000e+00 : f32
    %19 = vector.broadcast %cst_4 : f32 to vector<8x8xf32>
    %20 = arith.maximumf %18, %19 : vector<8x8xf32>
    %cst_5 = arith.constant 9.99999974E-5 : f32
    %21 = vector.broadcast %cst_5 : f32 to vector<8x8xf32>
    %22 = arith.maximumf %20, %21 : vector<8x8xf32>
    %23 = math.sqrt %22 : vector<8x8xf32>
    %c0_6 = arith.constant 0 : index
    %c0_7 = arith.constant 0 : index
    %24 = vector.load %arg1[%c0_6, %c0_7] : memref<8x1xi32, #tpu.memory_space<vmem>>, vector<8x1xi32>
    %c0_8 = arith.constant 0 : index
    %c0_9 = arith.constant 0 : index
    %25 = vector.load %arg2[%c0_8, %c0_9] : memref<1x8xi32, #tpu.memory_space<vmem>>, vector<1x8xi32>
    %26 = vector.broadcast %24 : vector<8x1xi32> to vector<8x8xi32>
    %27 = vector.broadcast %25 : vector<1x8xi32> to vector<8x8xi32>
    %28 = arith.cmpi eq, %26, %27 : vector<8x8xi32>
    %29 = arith.extui %28 : vector<8x8xi1> to vector<8x8xi32>
    %30 = arith.sitofp %29 : vector<8x8xi32> to vector<8x8xf32>
    %cst_10 = arith.constant 1.000000e+00 : f32
    %31 = vector.broadcast %cst_10 : f32 to vector<8x8xf32>
    %32 = arith.subf %31, %23 : vector<8x8xf32>
    %33 = math.exp %32 : vector<8x8xf32>
    %cst_11 = arith.constant 1.000000e+00 : f32
    %34 = vector.broadcast %cst_11 : f32 to vector<8x8xf32>
    %35 = arith.subf %34, %30 : vector<8x8xf32>
    %36 = arith.mulf %33, %35 : vector<8x8xf32>
    %cst_12 = arith.constant dense<0.000000e+00> : vector<8xf32>
    %37 = vector.multi_reduction <add>, %36, %cst_12 [1] : vector<8x8xf32> to vector<8xf32>
    %38 = vector.shape_cast %37 : vector<8xf32> to vector<8x1xf32>
    %cst_13 = arith.constant dense<0.000000e+00> : vector<8xf32>
    %39 = vector.multi_reduction <add>, %36, %cst_13 [0] : vector<8x8xf32> to vector<8xf32>
    %40 = vector.shape_cast %39 : vector<8xf32> to vector<1x8xf32>
    %41 = vector.broadcast %38 : vector<8x1xf32> to vector<8x8xf32>
    %42 = vector.broadcast %40 : vector<1x8xf32> to vector<8x8xf32>
    %43 = arith.addf %41, %42 : vector<8x8xf32>
    %44 = arith.cmpi sgt, %3, %2 : vector<8x8xi32>
    %45 = arith.extui %44 : vector<8x8xi1> to vector<8x8xi32>
    %46 = arith.sitofp %45 : vector<8x8xi32> to vector<8x8xf32>
    %47 = arith.mulf %30, %46 : vector<8x8xf32>
    %48 = math.log %43 : vector<8x8xf32>
    %49 = arith.addf %48, %23 : vector<8x8xf32>
    %50 = arith.mulf %47, %49 : vector<8x8xf32>
    %cst_14 = arith.constant 0.000000e+00 : f32
    %51 = vector.broadcast %cst_14 : f32 to vector<8x8xf32>
    %52 = arith.maximumf %50, %51 : vector<8x8xf32>
    %53 = arith.mulf %52, %52 : vector<8x8xf32>
    %54 = vector.shape_cast %53 : vector<8x8xf32> to vector<1x8x8xf32>
    %cst_15 = arith.constant dense<0.000000e+00> : vector<1xf32>
    %55 = vector.multi_reduction <add>, %54, %cst_15 [1, 2] : vector<1x8x8xf32> to vector<1xf32>
    %56 = vector.shape_cast %55 : vector<1xf32> to vector<1x1x1xf32>
    %57 = vector.extract %56[0, 0, 0] : f32 from vector<1x1x1xf32>
    %58 = vector.shape_cast %30 : vector<8x8xf32> to vector<1x8x8xf32>
    %cst_16 = arith.constant dense<0.000000e+00> : vector<1xf32>
    %59 = vector.multi_reduction <add>, %58, %cst_16 [1, 2] : vector<1x8x8xf32> to vector<1xf32>
    %60 = vector.shape_cast %59 : vector<1xf32> to vector<1x1x1xf32>
    %61 = vector.extract %60[0, 0, 0] : f32 from vector<1x1x1xf32>
    %cst_17 = arith.constant 8.000000e+00 : f32
    %62 = arith.subf %61, %cst_17 : f32
    %63 = arith.divf %57, %62 : f32
    %c0_18 = arith.constant 0 : index
    %c0_19 = arith.constant 0 : index
    %64 = memref.load %arg3[%c0_18, %c0_19] : memref<1x1xf32, #tpu.memory_space<smem>>
    memref.store %63, %arg3[%c0_18, %c0_19] : memref<1x1xf32, #tpu.memory_space<smem>>
    return
  }
}

</mosaic_0001>

<bundles_post_ra>
// kernel: tpu_custom_call.1
= control target key start
LH: loop header
LB: loop body
LE: loop exit
PB: predicated region body
PF: predicated region fallthrough
CT: control target
= control target key end

     0   :  { %s279_s0 = inlined_call_operand.vmem [shape: f32[8,128], index: 0, kind: input, shape index: {}]   ;;  %s280_s1 = inlined_call_operand.vmem [shape: s32[8,1], index: 1, kind: input, shape index: {}]   ;;  %s281_s2 = inlined_call_operand.vmem [shape: s32[1,8], index: 2, kind: input, shape index: {}]   ;;  %s282_s3 = inlined_call_operand.hbm [shape: f32[1,1], index: 3, kind: output, shape index: {}]  }
   0x1   :  { %v15_v0 = vld [vmem:[%s279_s0] sm:$0xff] }
   0x2   :  { %8 = vsyncpa [#allocation3], 0  ;;  %v234_v1 = vmov 0.0   ;;  %vm235_vm0 = vmmov 0   ;;  %v236_v2 = vmov 0   ;;  %v86_v3 = vlaneseq  ;;  %v116_v11 = vld [vmem:[%s280_s1] sm:$0xff] }
   0x3   :  { %200 = vmatprep.subr.mxu0 %v234_v1  ;;  %202 = vmatprep.mubr.msk.f32.mxu0 %vm235_vm0, %v234_v1  ;;  %vm94_vm2 = vcmask 64512   ;;  %v194_v31 = vld [vmem:[%s281_s2] ss:$0 sm:$0xff]  ;;  %s237_s20 = smov [#allocation2]  }
   0x4   :  { %201 = vmatpush3.xpose.msra.mxu0 %v15_v0  ;;  %215 = vset.pattern.permute.xlu0 %v236_v2  ;;  %v87_v4 = vshrl.u32 %v86_v3, 7  ;;  %v89_v5 = vand.u32 127, %v86_v3 }
   0x6   :  { %vm90_vm1 = vcmp.eq.s32.totalorder %v87_v4, %v89_v5  ;;  %vm143_vm6 = vcmp.gt.s32.totalorder %v89_v5, %v87_v4 }
   0x7   :  { %203 = vmatmul.mubr.f32.vlgmr.msra.gmra.mxu0 %v15_v0  ;;  %v193_v6 = vsel %vm90_vm1, 1.0, %v234_v1  ;;  %v196_v47 = vsel %vm143_vm6, 1.0, %v234_v1 }
  0xc7   :  { %v82_v7 = vpop.f32.mrf.mxu0 }
  0xc8   :  { %v93_v8 = vmul.f32 %v193_v6, %v82_v7  ;;  %v105_v19 = vmul.f32 2.0, %v82_v7 }
  0xc9   :  { %v204_v9 = vpop.f32.mrf.mxu0 }
  0xca   :  { %v95_v10 = vsel %vm94_vm2, %v93_v8, 0.0 }
  0xcb   :  { %96 = vadd.xlane.f32.xlu0 %v95_v10  ;;  %v98_v12 = vrot.slane %v95_v10, 4 }
  0xcd   :  { %v99_v13 = vadd.f32 %v98_v12, %v95_v10 }
  0xcf   :  { %v100_v14 = vrot.slane %v99_v13, 2 }
  0xd1   :  { %v101_v15 = vadd.f32 %v100_v14, %v99_v13 }
  0xd3   :  { %v102_v16 = vrot.slane %v101_v15, 1 }
  0xd5   :  { %v103_v17 = vadd.f32 %v102_v16, %v101_v15 }
  0xe1   :  { %119 = vperm.xlu0 %215, %v116_v11  }
 0x154   :  { %v97_v18 = vpop.xlane.xlu0 %96 }
 0x155   :  { %v104_v20 = vadd.f32 %v103_v17, %v97_v18 }
 0x157   :  { %v106_v21 = vsub.f32 %v104_v20, %v105_v19 }
 0x159   :  { %v107_v22 = vmax.f32 %v106_v21, 0.0 }
 0x15b   :  { %v108_v23 = vmax.f32 %v107_v22, 0.0001 }
 0x15c   :  { %v120_v32 = vpop.permute.xlu0 %119 }
 0x15d   :  { %216 = vrsqrt.f32 %v108_v23  ;;  %vm111_vm3 = vcmp.eq.f32.partialorder %v108_v23, inf  ;;  %v114_v26 = vand.u32 2147483648, %v108_v23  ;;  %vm113_vm4 = vcmp.eq.f32.partialorder %v108_v23, 0.0 }
 0x15e   :  { %vm125_vm5 = vcmp.eq.s32.totalorder %v120_v32, %v194_v31 }
 0x15f   :  { %v195_v33 = vsel %vm125_vm5, 1.0, %v234_v1 }
 0x160   :  { %v131_v34 = vsub.f32 1.0, %v195_v33  ;;  %v146_v49 = vmul.f32 %v196_v47, %v195_v33  ;;  %v163_v55 = vsel %vm94_vm2, %v195_v33, 0.0 }
 0x16a   :  { %v217_v24 = vpop.eup %216 }
 0x16b   :  { %v110_v25 = vmul.f32 %v217_v24, %v108_v23 }
 0x16d   :  { %v112_v27 = vsel %vm111_vm3, %v108_v23, %v110_v25 }
 0x16e   :  { %v115_v28 = vsel %vm113_vm4, %v114_v26, %v112_v27 }
 0x16f   :  { %v128_v29 = vsub.f32 1.0, %v115_v28 }
 0x171   :  { %v129_v30 = vmul.f32 1.442695, %v128_v29 }
 0x173   :  { %218 = vpow2.f32 %v129_v30 }
 0x180   :  { %v219_v35 = vpop.eup %218 }
 0x181   :  { %v132_v36 = vmul.f32 %v219_v35, %v131_v34 }
 0x183   :  { %v133_v37 = vsel %vm94_vm2, %v132_v36, 0.0 }
 0x184   :  { %134 = vadd.xlane.f32.xlu1 %v133_v37  ;;  %v136_v38 = vrot.slane %v133_v37, 4 }
 0x186   :  { %v137_v39 = vadd.f32 %v136_v38, %v133_v37 }
 0x188   :  { %v138_v40 = vrot.slane %v137_v39, 2 }
 0x18a   :  { %v139_v41 = vadd.f32 %v138_v40, %v137_v39 }
 0x18c   :  { %v140_v42 = vrot.slane %v139_v41, 1 }
 0x18e   :  { %v141_v43 = vadd.f32 %v140_v42, %v139_v41 }
 0x20d   :  { %v135_v44 = vpop.xlane.xlu1 %134 }
 0x20e   :  { %v142_v45 = vadd.f32 %v141_v43, %v135_v44 }
 0x210   :  { %220 = vlog2.f32 %v142_v45 }
 0x21d   :  { %v221_v46 = vpop.eup %220 }
 0x21e   :  { %v148_v48 = vmul.f32 0.6931472, %v221_v46 }
 0x220   :  { %v149_v50 = vadd.f32 %v148_v48, %v115_v28 }
 0x222   :  { %v150_v51 = vmul.f32 %v149_v50, %v146_v49 }
 0x224   :  { %v151_v52 = vmax.f32 %v150_v51, 0.0 }
 0x226   :  { %v152_v53 = vmul.f32 %v151_v52, %v151_v52 }
 0x228   :  { %v153_v54 = vsel %vm94_vm2, %v152_v53, 0.0 }
 0x229   :  { %154 = vadd.xlane.f32.xlu1 %v153_v54 }
 0x22d   :  { %164 = vadd.xlane.f32.xlu1 %v163_v55 }
 0x2b2   :  { %v155_v56 = vpop.xlane.xlu1 %154 }
 0x2b3   :  { %v156_v57 = vrot.slane %v155_v56, 4 }
 0x2b5   :  { %v157_v58 = vadd.f32 %v156_v57, %v155_v56 }
 0x2b6   :  { %v165_v59 = vpop.xlane.xlu1 %164 }
 0x2b7   :  { %v158_v60 = vrot.slane %v157_v58, 2  ;;  %v166_v61 = vrot.slane %v165_v59, 4 }
 0x2b9   :  { %v167_v62 = vadd.f32 %v166_v61, %v165_v59  ;;  %v159_v63 = vadd.f32 %v158_v60, %v157_v58 }
 0x2bb   :  { %v168_v0 = vrot.slane %v167_v62, 2  ;;  %v160_v1 = vrot.slane %v159_v63, 1 }
 0x2bd   :  { %v169_v2 = vadd.f32 %v168_v0, %v167_v62  ;;  %v161_v3 = vadd.f32 %v160_v1, %v159_v63 }
 0x2bf   :  { %205 = vpush %v161_v3  ;;  %v170_v4 = vrot.slane %v169_v2, 1 }
 0x2c1   :  { %v171_v5 = vadd.f32 %v170_v4, %v169_v2 }
 0x2c3   :  { %207 = vpush %v171_v5 }
 0x2f0   :  { %s206_s2 = spop %205 }
 0x2f4   :  { %s208_s16 = spop %207 }
 0x2f5   :  { %s197_s17 = sadd.f32 -8.0, %s208_s16 }
 0x2f7   :  { %v174_v6 = vstv %s197_s17 }
 0x2f8   :  { %222 = vrcp.f32 %v174_v6 }
 0x305   :  { %v223_v7 = vpop.eup %222 }
 0x306   :  { %209 = vpush %v223_v7 }
 0x337   :  { %s210_s18 = spop %209 }
 0x338   :  { %s177_s19 = smul.f32 %s210_s18, %s206_s2 }
 0x33a   :  { %179 = sst [smem:[#allocation2]] %s177_s19 }
 0x33b   :  { %187 = dma.smem_to_hbm %s237_s20, 16, %s282_s3, [#allocation3]  }
 0x33c   :  { %232 = dma.done.wait [#allocation3], 16  }
 0x33d   :  { %233 = vsyncadd [#allocation3], 4294967280 }
 0x33e   :  { %191 = sfence }
 0x33f   :  { %192 = vsyncpa [#allocation3], 1 }

</bundles_post_ra>
